<compile_context>
chip_gen: v6e
topology: v6e:2x2x1
jax: 0.10.0
libtpu: 0.0.40
codegen_flags: <defaults>
</compile_context>

<pallas_src>
import jax
import jax.numpy as jnp
from jax.experimental import pallas as pl
from jax.experimental.pallas import tpu as pltpu


def _round_up(x, m):
    return ((x + m - 1) // m) * m


def _unembed_kernel_fullk(x_ref, w_ref, o_ref):
    # Single pass over K: no accumulator, no pl.when, direct store.
    o_ref[...] = jnp.dot(
        x_ref[...], w_ref[...], preferred_element_type=jnp.float32
    ).astype(o_ref.dtype)


def _unembed_kernel_ksplit(x_ref, w_ref, o_ref, acc_ref):
    # Fallback for very large d_model: K is the last ("arbitrary") grid axis.
    @pl.when(pl.program_id(2) == 0)
    def _():
        acc_ref[...] = jnp.zeros_like(acc_ref)

    acc_ref[...] += jnp.dot(
        x_ref[...], w_ref[...], preferred_element_type=jnp.float32
    )

    @pl.when(pl.program_id(2) == pl.num_programs(2) - 1)
    def _():
        o_ref[...] = acc_ref[...].astype(o_ref.dtype)


def _choose_tiles(M, K, N, tm, tn, tk):
    """Pick tiles from an explicit VMEM budget (sized for v7x's 64 MiB)."""
    in_bytes, out_bytes = 2, 4  # bf16 inputs, f32 output
    if tn is None:
        tn = min(1024, _round_up(N, 128))
    if tm is None:
        tm = min(256, _round_up(M, 8))
    if tk is None:
        # Double-buffered working set (x tile + w tile + out tile).
        budget = 28 * 1024 * 1024

        def need(tk_):
            return 2 * in_bytes * (tm * tk_ + tk_ * tn) + 2 * out_bytes * tm * tn

        tk = K if need(K) <= budget else 1024
    return tm, tn, tk


def unembed(resid, w_u, *, tm=None, tn=None, tk=None):
    """resid: [batch, pos, d_model], w_u: [d_model, d_vocab] -> [batch, pos, d_vocab]."""
    batch, pos, d_model = resid.shape
    d_model_w, d_vocab = w_u.shape
    assert d_model == d_model_w

    M, K, N = batch * pos, d_model, d_vocab
    out_dtype = resid.dtype

    tm, tn, tk = _choose_tiles(M, K, N, tm, tn, tk)

    # Pad to tile multiples (zero padding is exact for a matmul); the kernel
    # then always uses full, unmasked (8,128)-aligned tiles.
    Mp, Kp, Np = _round_up(M, tm), _round_up(K, tk), _round_up(N, tn)

    x2d = resid.reshape(M, K).astype(jnp.bfloat16)
    w = w_u.astype(jnp.bfloat16)
    if (Mp, Kp) != (M, K):
        x2d = jnp.pad(x2d, ((0, Mp - M), (0, Kp - K)))
    if (Kp, Np) != (K, N):
        w = jnp.pad(w, ((0, Kp - K), (0, Np - N)))

    full_k = tk == Kp
    in_bytes, out_bytes = 2, 4
    vmem_need = 2 * in_bytes * (tm * tk + tk * tn) + 2 * out_bytes * tm * tn
    if not full_k:
        vmem_need += 4 * tm * tn  # f32 accumulator scratch
    vmem_limit = min(max(int(vmem_need * 1.5) + (8 << 20), 32 << 20), 48 << 20)

    if full_k:
        # Grid: vocab (N) outermost, M innermost -> W_u column panel is DMA'd
        # exactly once; both axes parallel (megacore / 2-TC sharding).
        grid_spec = pltpu.PrefetchScalarGridSpec(
            num_scalar_prefetch=0,
            grid=(Np // tn, Mp // tm),
            in_specs=[
                pl.BlockSpec((tm, Kp), lambda j, i: (i, 0)),
                pl.BlockSpec((Kp, tn), lambda j, i: (0, j)),
            ],
            out_specs=pl.BlockSpec((tm, tn), lambda j, i: (i, j)),
        )
        kernel = _unembed_kernel_fullk
        dim_sems = ("parallel", "parallel")
    else:
        grid_spec = pltpu.PrefetchScalarGridSpec(
            num_scalar_prefetch=0,
            grid=(Np // tn, Mp // tm, Kp // tk),
            in_specs=[
                pl.BlockSpec((tm, tk), lambda j, i, k: (i, k)),
                pl.BlockSpec((tk, tn), lambda j, i, k: (k, j)),
            ],
            out_specs=pl.BlockSpec((tm, tn), lambda j, i, k: (i, j)),
            scratch_shapes=[pltpu.VMEM((tm, tn), jnp.float32)],
        )
        kernel = _unembed_kernel_ksplit
        dim_sems = ("parallel", "parallel", "arbitrary")

    out2d = pl.pallas_call(
        kernel,
        out_shape=jax.ShapeDtypeStruct((Mp, Np), out_dtype),
        grid_spec=grid_spec,
        compiler_params=pltpu.CompilerParams(
            dimension_semantics=dim_sems,
            vmem_limit_bytes=vmem_limit,
        ),
    )(x2d, w)

    return out2d[:M, :N].reshape(batch, pos, N)


if __name__ == "__main__":
    # Small config consistent with the module: d_model=32, d_vocab=256,
    # batch=2, pos=8, init_range=0.02 (GPT-2-style).
    batch, pos, d_model, d_vocab = 2, 8, 32, 256
    init_range = 0.02

    key = jax.random.PRNGKey(0)
    k_resid, k_w = jax.random.split(key)

    resid = jax.random.normal(k_resid, (batch, pos, d_model), dtype=jnp.float32)
    # Deterministic parameter init mirroring nn.init.normal_(std=init_range).
    w_u = init_range * jax.random.normal(k_w, (d_model, d_vocab), dtype=jnp.float32)

    logits = unembed(resid, w_u)
    logits = jax.block_until_ready(logits)

    # Sanity-check against plain-JAX f32 reference (inputs go through the MXU
    # as bf16 with f32 accumulation, so use a tolerance suited to bf16).
    ref = jnp.einsum("bpd,dv->bpv", resid, w_u)
    assert logits.shape == (batch, pos, d_vocab)
    assert jnp.allclose(logits, ref, atol=5e-3, rtol=5e-2)

    print("KERNEL_OK")
</pallas_src>

<mosaic_0001>
module attributes {stable_mosaic.version = 11 : i64} {
  func.func @_unembed_kernel_fullk(%arg0: i32, %arg1: i32, %arg2: memref<16x32xbf16, #tpu.memory_space<vmem>>, %arg3: memref<32x256xbf16, #tpu.memory_space<vmem>>, %arg4: memref<16x256xf32, #tpu.memory_space<vmem>>) attributes {dimension_semantics = [#tpu.dimension_semantics<parallel>, #tpu.dimension_semantics<parallel>], iteration_bounds = array<i64: 1, 1>, scalar_prefetch = 0 : i64, scratch_operands = 0 : i64, tpu.core_type = #tpu.core_type<tc>, window_params = [{transform_indices = @transform_0, window_bounds = array<i64: 16, 32>}, {transform_indices = @transform_1, window_bounds = array<i64: 32, 256>}, {transform_indices = @transform_2, window_bounds = array<i64: 16, 256>}]} {
    %c0 = arith.constant 0 : index
    %c0_0 = arith.constant 0 : index
    %0 = vector.load %arg2[%c0, %c0_0] : memref<16x32xbf16, #tpu.memory_space<vmem>>, vector<16x32xbf16>
    %c0_1 = arith.constant 0 : index
    %c0_2 = arith.constant 0 : index
    %1 = vector.load %arg3[%c0_1, %c0_2] : memref<32x256xbf16, #tpu.memory_space<vmem>>, vector<32x256xbf16>
    %cst = arith.constant dense<0.000000e+00> : vector<16x256xf32>
    %2 = tpu.matmul %0, %1, %cst {dimension_numbers = #tpu.dot_dimension_numbers<[1], [0], [0], [1], [0, 0, 1, 1], [], []>} : vector<16x32xbf16>, vector<32x256xbf16>, vector<16x256xf32> -> vector<16x256xf32>
    %c0_3 = arith.constant 0 : index
    %c0_4 = arith.constant 0 : index
    %3 = vector.load %arg4[%c0_3, %c0_4] : memref<16x256xf32, #tpu.memory_space<vmem>>, vector<16x256xf32>
    tpu.vector_store %arg4[%c0_3, %c0_4], %2 {strides = array<i32>} : memref<16x256xf32, #tpu.memory_space<vmem>>, vector<16x256xf32>,
    return
  }
  func.func @transform_0(%arg0: i32, %arg1: i32) -> (i32, i32) {
    %c0_i32 = arith.constant 0 : i32
    %c0_i32_0 = arith.constant 0 : i32
    return %arg1, %c0_i32 : i32, i32
  }
  func.func @transform_1(%arg0: i32, %arg1: i32) -> (i32, i32) {
    %c0_i32 = arith.constant 0 : i32
    %c0_i32_0 = arith.constant 0 : i32
    return %c0_i32, %arg0 : i32, i32
  }
  func.func @transform_2(%arg0: i32, %arg1: i32) -> (i32, i32) {
    %c0_i32 = arith.constant 0 : i32
    return %arg1, %arg0 : i32, i32
  }
}

</mosaic_0001>

<bundles_post_ra>
// kernel: tpu_custom_call.1
= control target key start
LH: loop header
LB: loop body
LE: loop exit
PB: predicated region body
PF: predicated region fallthrough
CT: control target
= control target key end

     0   :  { %7 = vsyncpa [#allocation3], 0  ;;  %s264_s0 = inlined_call_operand.hbm [shape: bf16[16,32], index: 0, kind: input, shape index: {}]   ;;  %s265_s1 = inlined_call_operand.hbm [shape: bf16[32,256], index: 1, kind: input, shape index: {}]   ;;  %s266_s2 = inlined_call_operand.hbm [shape: f32[16,256], index: 2, kind: output, shape index: {}]  }
   0x1   :  { %8 = vsyncpa [#allocation6], 0 }
   0x2   :  { %9 = vsyncpa [#allocation4], 0  ;;  %s230_s9 = smov [#allocation2]  }
   0x3   :  { %s15_s10 = sshll.u32 %s230_s9, 4  ;;  %s16_s10 = int_to_ptr.vmem [resolvable:$true] %s15_s10 }
   0x4   :  { %s172_s11 = scalar_lea.vmem %s16_s10, 128  ;;  %p177_p1 = scmp.lt.s32.totalorder %s16_s10, %s16_s10 }
   0x5   :  { %p173_p0 = scmp.ne.s32.totalorder %s16_s10, %s172_s11  ;;  %p178_p2 = scmp.lt.s32.totalorder %s172_s11, %s172_s11 }
   0x7   :  { %p179_p3 = por %p178_p2, %p177_p1 }
   0x9   :  { %p180_p4 = pnand %p179_p3, %p173_p0 }
   0xb   :  { %183 = shalt.err (!%p180_p4)
}
   0xc   :  { %s231_s12 = smov 64   ;;  %s232_s13 = smov 4  }
   0xd   :  { %21 = dma.hbm_to_vmem [thread:$0]  %s264_s0, 128, %s16_s10, [#allocation3], %s231_s12, %s231_s12, %s232_s13  }
   0xe   :  { %s233_s16 = smov [#allocation5]  }
   0xf   :  { %s27_s17 = sshll.u32 %s233_s16, 4  ;;  %s28_s17 = int_to_ptr.vmem [resolvable:$true] %s27_s17 }
  0x10   :  { %s192_s18 = scalar_lea.vmem %s28_s17, 512  ;;  %p197_p6 = scmp.lt.s32.totalorder %s28_s17, %s28_s17 }
  0x11   :  { %p193_p5 = scmp.ne.s32.totalorder %s28_s17, %s192_s18  ;;  %p198_p7 = scmp.lt.s32.totalorder %s192_s18, %s192_s18 }
  0x13   :  { %p199_p8 = por %p198_p7, %p197_p6 }
  0x15   :  { %p200_p9 = pnand %p199_p8, %p193_p5 }
  0x17   :  { %203 = shalt.err (!%p200_p9)
}
  0x18   :  { %s234_s19 = smov 128   ;;  %s235_s20 = smov 8  }
  0x19   :  { %33 = dma.hbm_to_vmem [thread:$0]  %s265_s1, 512, %s28_s17, [#allocation6], %s234_s19, %s234_s19, %s235_s20  }
  0x1a   :  { %224 = dma.done.wait [#allocation3], 128  }
  0x1b   :  { %225 = vsyncadd [#allocation3], 4294967168 }
  0x1c   :  { %226 = dma.done.wait [#allocation6], 512  }
  0x1d   :  { %227 = vsyncadd [#allocation6], 4294966784  ;;  %v236_v0 = vmov 0   ;;  %v157_v1 = vld [vmem:[#allocation5 + $0x14] ss:$8 sps:$4 sm:$0xff]   ;;  %vm72_vm0 = vcmask 261120  }
  0x1e   :  { %108 = vmatprep.mubr.bf16.mxu0 %v236_v0  ;;  %v159_v2 = vld [vmem:[#allocation5 + $0x10] ss:$8 sps:$4 sm:$0xff]   ;;  %88 = vmatprep.subr.bf16.mxu0 %v157_v1  ;;  %v160_v3 = vld [vmem:[#allocation5 + $0x4] ss:$8 sps:$4 sm:$0xff]   ;;  %v162_v4 = vld [vmem:[#allocation5] ss:$8 sps:$4 sm:$0xff]  }
  0x1f   :  { %89 = vmatpush1.bf16.msra.mxu0 %v159_v2  ;;  %v163_v5 = vld [vmem:[#allocation2] sm:$0xff]   ;;  %s237_s0 = smov [#allocation7]  }
  0x20   :  { %90 = vmatprep.subr.bf16.mxu0 %v160_v3  ;;  %s128_s1 = sshll.u32 %s237_s0, 4  ;;  %s129_s1 = int_to_ptr.vmem [resolvable:$true] %s128_s1 }
  0x21   :  { %s204_s23 = scalar_lea.vmem %s129_s1, 512  ;;  %p209_p11 = scmp.lt.s32.totalorder %s129_s1, %s129_s1 }
  0x22   :  { %p205_p10 = scmp.ne.s32.totalorder %s129_s1, %s204_s23  ;;  %p210_p12 = scmp.lt.s32.totalorder %s204_s23, %s204_s23 }
  0x23   :  { %91 = vmatpush1.bf16.msra.mxu0 %v162_v4 }
  0x24   :  { %p211_p13 = por %p210_p12, %p209_p11 }
  0x26   :  { %146 = vmatmul.mubr.msk.bf16.vlgmr.msra.gmra.mxu0 %vm72_vm0, %v163_v5  ;;  %p212_p0 = pnand %p211_p13, %p205_p10 }
  0xe6   :  { %v110_v6 = vpop.f32.mrf.mxu0 }
  0xe7   :  { %119 = vst [vmem:[#allocation7] sm:$0xff] %v110_v6 }
  0xe8   :  { %v112_v7 = vpop.f32.mrf.mxu0 }
  0xe9   :  { %120 = vst [vmem:[#allocation7 + $0x8] sm:$0xff] %v112_v7 }
  0xea   :  { %v114_v8 = vpop.f32.mrf.mxu0 }
  0xeb   :  { %121 = vst [vmem:[#allocation7 + $0x10] sm:$0xff] %v114_v8 }
  0xec   :  { %v116_v9 = vpop.f32.mrf.mxu0 }
  0xed   :  { %122 = vst [vmem:[#allocation7 + $0x18] sm:$0xff] %v116_v9 }
  0xee   :  { %215 = shalt.err (!%p212_p0)
}
  0xef   :  { %s238_s24 = smov 256   ;;  %s239_s25 = smov 16  }
  0xf0   :  { %134 = dma.vmem_to_hbm [thread:$0]  %s129_s1, 512, %s266_s2, [#allocation4], %s238_s24, %s238_s24, %s239_s25  }
  0xf1   :  { %228 = dma.done.wait [#allocation4], 512  }
  0xf2   :  { %229 = vsyncadd [#allocation4], 4294966784 }
  0xf3   :  { %138 = vsyncpa [#allocation3], 1 }
  0xf4   :  { %139 = vsyncpa [#allocation6], 1 }
  0xf5   :  { %140 = vsyncpa [#allocation4], 1 }

</bundles_post_ra>
